<compile_context>
chip_gen: v6e
topology: v6e:2x2x1
jax: 0.10.0
libtpu: 0.0.40
codegen_flags: <defaults>
</compile_context>

<pallas_src>
import jax
import jax.numpy as jnp
from jax import lax
from jax.experimental import pallas as pl
from jax.experimental.pallas import tpu as pltpu


BLK = 16  # serial steps per unrolled block


def ricker_kernel(params_ref, n0_ref, sigma_ref, temp_ref, noise_ref, out_ref,
                  expc_ref, eps_ref):
    # params_ref: SMEM (4,)    -> alpha, beta, bx, cx
    # n0_ref:     SMEM (1,)
    # sigma_ref:  SMEM (1,)
    # temp_ref:   VMEM (P, 1)   Temp[i] at row i (rows >= T-1 are zero padding)
    # noise_ref:  VMEM (P, 1)   N(0,1) draw for step i at row i
    # out_ref:    VMEM (P+1, 1) trajectory; out[0] = N0, out[i+1] from step i
    # expc_ref:   VMEM (P, 1)   scratch: exp(alpha*(1 + bx*T + cx*T^2))
    # eps_ref:    VMEM (P, 1)   scratch: sigma * noise
    alpha = params_ref[0]
    beta = params_ref[1]
    bx = params_ref[2]
    cx = params_ref[3]
    sigma = sigma_ref[0]

    # ---- vectorized prologue: hoist per-step Temp/noise math off the chain ----
    t = temp_ref[...]                                          # (P, 1)
    expc_ref[...] = jnp.exp(alpha * (1.0 + bx * t + cx * t * t))
    eps_ref[...] = sigma * noise_ref[...]

    # Loop-invariant vregs hoisted once (JAX does not CSE broadcasts in loops).
    k_vec = jnp.full((1, 1), -alpha * beta, dtype=jnp.float32)
    n0_vec = jnp.full((1, 1), n0_ref[0], dtype=jnp.float32)

    # out[0] = N0: single off-chain store, no per-block select needed.
    out_ref[0:1, :] = n0_vec

    n_blocks = expc_ref.shape[0] // BLK                        # static

    def block_body(b, state):
        base = pl.multiple_of(b * BLK, BLK)
        for j in range(BLK):                                   # unrolled x BLK
            idx = base + j
            # Off-chain (1,1) loads of the precomputed per-step terms.
            ec = expc_ref[pl.ds(idx, 1), :]
            ep = eps_ref[pl.ds(idx, 1), :]
            # Re-associated update:
            #   new = state*exp(c + k*state) + eps
            #       = (state*expc) * exp(k*state) + eps
            u = jnp.exp(k_vec * state)        # chain: mul -> EUP exp
            s2 = state * ec                   # independent, overlaps exp latency
            state = u * s2 + ep               # chain: mul -> add
            # Fire-and-forget (1,1) store, off the dependence chain.
            out_ref[pl.ds(idx + 1, 1), :] = state
        return state

    unroll = True if n_blocks <= 8 else 4
    lax.fori_loop(0, n_blocks, block_body, n0_vec, unroll=unroll)


def ricker_forward(model_params, N0, Temp, sigma, noise):
    """Pallas wrapper mirroring Ricker.forward.

    model_params: (4,) array [alpha, beta, bx, cx]
    N0:           scalar initial population
    Temp:         any shape squeezing to (T,)
    sigma:        scalar noise scale
    noise:        (T,) pre-drawn standard-normal samples (stand-in for
                  torch.normal drawn inside the loop)
    Returns: (T,) float32 trajectory.
    """
    temp_1d = jnp.asarray(Temp, jnp.float32).squeeze().reshape(-1)
    T = int(temp_1d.shape[0])
    noise_1d = jnp.asarray(noise, jnp.float32).reshape(-1)

    n_steps = max(T - 1, 0)                                # recurrence steps
    P = max(BLK, ((n_steps + BLK - 1) // BLK) * BLK)       # padded step count
    R = P + 1                                              # output rows

    temp_p = jnp.zeros((P, 1), jnp.float32)
    noise_p = jnp.zeros((P, 1), jnp.float32)
    if n_steps > 0:
        temp_p = temp_p.at[:n_steps, 0].set(temp_1d[:n_steps])
        noise_p = noise_p.at[:n_steps, 0].set(noise_1d[:n_steps])

    params_f32 = jnp.asarray(model_params, jnp.float32).reshape(4)
    n0_arr = jnp.asarray(N0, jnp.float32).reshape(1)
    sigma_arr = jnp.asarray(sigma, jnp.float32).reshape(1)

    # Lane-padded VMEM footprint: each (rows, 1) f32 buffer occupies rows*128*4 B.
    # Raise the scoped-VMEM limit only when the padded layout would not fit the
    # smallest default (16 MiB on v5e); cap at 64 MiB so it is safe on v7x too.
    # TODO(synk): for very large T switch to a lane-dense (rows, 128) layout or
    # stream Temp/noise from HBM via pl.ANY + make_async_copy.
    est_vmem = (4 * P + R) * 128 * 4
    compiler_params = None
    if est_vmem > (12 << 20):
        compiler_params = pltpu.CompilerParams(
            vmem_limit_bytes=int(min(2 * est_vmem + (1 << 20), 64 << 20)))

    out = pl.pallas_call(
        ricker_kernel,
        out_shape=jax.ShapeDtypeStruct((R, 1), jnp.float32),
        in_specs=[
            pl.BlockSpec(memory_space=pltpu.MemorySpace.SMEM),  # params
            pl.BlockSpec(memory_space=pltpu.MemorySpace.SMEM),  # N0
            pl.BlockSpec(memory_space=pltpu.MemorySpace.SMEM),  # sigma
            pl.BlockSpec(memory_space=pltpu.MemorySpace.VMEM),  # Temp
            pl.BlockSpec(memory_space=pltpu.MemorySpace.VMEM),  # noise
        ],
        out_specs=pl.BlockSpec(memory_space=pltpu.MemorySpace.VMEM),
        scratch_shapes=[
            pltpu.VMEM((P, 1), jnp.float32),  # expc (precomputed exp factors)
            pltpu.VMEM((P, 1), jnp.float32),  # eps  (precomputed noise terms)
        ],
        compiler_params=compiler_params,
    )(params_f32, n0_arr, sigma_arr, temp_p, noise_p)

    return out[:T, 0]


def ricker_reference(model_params, N0, Temp, sigma, noise):
    """Pure-JAX float32 reference matching the PyTorch loop (same pre-drawn noise)."""
    alpha, beta, bx, cx = [jnp.float32(v) for v in jnp.asarray(model_params)]
    temp_1d = jnp.asarray(Temp, jnp.float32).squeeze().reshape(-1)
    noise_1d = jnp.asarray(noise, jnp.float32).reshape(-1)
    T = temp_1d.shape[0]
    out = [jnp.float32(N0)]
    for i in range(T - 1):
        eps = jnp.float32(sigma) * noise_1d[i]
        nxt = out[i] * jnp.exp(
            alpha * (1.0 - beta * out[i] + bx * temp_1d[i] + cx * temp_1d[i] ** 2)
        ) + eps
        out.append(nxt)
    return jnp.stack(out)


if __name__ == "__main__":
    key = jax.random.PRNGKey(0)
    k_temp, k_noise = jax.random.split(key)

    T = 16
    # Deterministic parameters (alpha, beta, bx, cx) — synthetic init.
    model_params = jnp.array([0.5, 0.1, 0.02, -0.001], dtype=jnp.float32)
    N0 = 1.5
    sigma = 0.05

    # Temp shaped like a (1, T) series (squeezed inside forward, as in torch).
    Temp = 10.0 + 5.0 * jax.random.normal(k_temp, (1, T), dtype=jnp.float32)
    # Pre-drawn standard-normal samples standing in for torch.normal per step.
    noise = jax.random.normal(k_noise, (T,), dtype=jnp.float32)

    out = ricker_forward(model_params, N0, Temp, sigma, noise)
    out = jax.block_until_ready(out)

    ref = ricker_reference(model_params, N0, Temp, sigma, noise)
    assert out.shape == (T,)
    assert jnp.allclose(out, ref, rtol=1e-4, atol=1e-5), (out, ref)

    print("KERNEL_OK")
</pallas_src>

<mosaic_0001>
module attributes {stable_mosaic.version = 11 : i64} {
  func.func @ricker_kernel(%arg0: memref<4xf32, #tpu.memory_space<smem>>, %arg1: memref<1xf32, #tpu.memory_space<smem>>, %arg2: memref<1xf32, #tpu.memory_space<smem>>, %arg3: memref<16x1xf32, #tpu.memory_space<vmem>>, %arg4: memref<16x1xf32, #tpu.memory_space<vmem>>, %arg5: memref<17x1xf32, #tpu.memory_space<vmem>>, %arg6: memref<16x1xf32, #tpu.memory_space<vmem>>, %arg7: memref<16x1xf32, #tpu.memory_space<vmem>>) attributes {dimension_semantics = [], scalar_prefetch = 0 : i64, scratch_operands = 2 : i64, tpu.core_type = #tpu.core_type<tc>} {
    %c0 = arith.constant 0 : index
    %0 = memref.load %arg0[%c0] : memref<4xf32, #tpu.memory_space<smem>>
    %c1 = arith.constant 1 : index
    %1 = memref.load %arg0[%c1] : memref<4xf32, #tpu.memory_space<smem>>
    %c2 = arith.constant 2 : index
    %2 = memref.load %arg0[%c2] : memref<4xf32, #tpu.memory_space<smem>>
    %c3 = arith.constant 3 : index
    %3 = memref.load %arg0[%c3] : memref<4xf32, #tpu.memory_space<smem>>
    %c0_0 = arith.constant 0 : index
    %4 = memref.load %arg2[%c0_0] : memref<1xf32, #tpu.memory_space<smem>>
    %c0_1 = arith.constant 0 : index
    %c0_2 = arith.constant 0 : index
    %5 = vector.load %arg3[%c0_1, %c0_2] : memref<16x1xf32, #tpu.memory_space<vmem>>, vector<16x1xf32>
    %6 = vector.broadcast %2 : f32 to vector<16x1xf32>
    %7 = arith.mulf %6, %5 : vector<16x1xf32>
    %cst = arith.constant 1.000000e+00 : f32
    %8 = vector.broadcast %cst : f32 to vector<16x1xf32>
    %9 = arith.addf %8, %7 : vector<16x1xf32>
    %10 = vector.broadcast %3 : f32 to vector<16x1xf32>
    %11 = arith.mulf %10, %5 : vector<16x1xf32>
    %12 = arith.mulf %11, %5 : vector<16x1xf32>
    %13 = arith.addf %9, %12 : vector<16x1xf32>
    %14 = vector.broadcast %0 : f32 to vector<16x1xf32>
    %15 = arith.mulf %14, %13 : vector<16x1xf32>
    %16 = math.exp %15 : vector<16x1xf32>
    %c0_3 = arith.constant 0 : index
    %c0_4 = arith.constant 0 : index
    %17 = vector.load %arg6[%c0_3, %c0_4] : memref<16x1xf32, #tpu.memory_space<vmem>>, vector<16x1xf32>
    tpu.vector_store %arg6[%c0_3, %c0_4], %16 {strides = array<i32>} : memref<16x1xf32, #tpu.memory_space<vmem>>, vector<16x1xf32>,
    %c0_5 = arith.constant 0 : index
    %c0_6 = arith.constant 0 : index
    %18 = vector.load %arg4[%c0_5, %c0_6] : memref<16x1xf32, #tpu.memory_space<vmem>>, vector<16x1xf32>
    %19 = vector.broadcast %4 : f32 to vector<16x1xf32>
    %20 = arith.mulf %19, %18 : vector<16x1xf32>
    %c0_7 = arith.constant 0 : index
    %c0_8 = arith.constant 0 : index
    %21 = vector.load %arg7[%c0_7, %c0_8] : memref<16x1xf32, #tpu.memory_space<vmem>>, vector<16x1xf32>
    tpu.vector_store %arg7[%c0_7, %c0_8], %20 {strides = array<i32>} : memref<16x1xf32, #tpu.memory_space<vmem>>, vector<16x1xf32>,
    %cst_9 = arith.constant 0.000000e+00 : f32
    %22 = arith.subf %cst_9, %0 : f32
    %23 = arith.mulf %22, %1 : f32
    %24 = vector.broadcast %23 : f32 to vector<1x1xf32>
    %c0_10 = arith.constant 0 : index
    %25 = memref.load %arg1[%c0_10] : memref<1xf32, #tpu.memory_space<smem>>
    %26 = vector.broadcast %25 : f32 to vector<1x1xf32>
    %c0_11 = arith.constant 0 : index
    %c0_12 = arith.constant 0 : index
    %27 = vector.load %arg5[%c0_11, %c0_12] : memref<17x1xf32, #tpu.memory_space<vmem>>, vector<1x1xf32>
    tpu.vector_store %arg5[%c0_11, %c0_12], %26 {strides = array<i32>} : memref<17x1xf32, #tpu.memory_space<vmem>>, vector<1x1xf32>,
    %c0_i32 = arith.constant 0 : i32
    %c16_i32 = arith.constant 16 : i32
    %28 = arith.muli %c0_i32, %c16_i32 : i32
    %29 = tpu.assume_multiple %28, 16 : i32
    %c0_i32_13 = arith.constant 0 : i32
    %30 = arith.addi %29, %c0_i32_13 : i32
    %31 = arith.index_cast %30 : i32 to index
    %c0_14 = arith.constant 0 : index
    %32 = vector.load %arg6[%31, %c0_14] : memref<16x1xf32, #tpu.memory_space<vmem>>, vector<1x1xf32>
    %33 = arith.index_cast %30 : i32 to index
    %c0_15 = arith.constant 0 : index
    %34 = vector.load %arg7[%33, %c0_15] : memref<16x1xf32, #tpu.memory_space<vmem>>, vector<1x1xf32>
    %35 = arith.mulf %24, %26 : vector<1x1xf32>
    %36 = math.exp %35 : vector<1x1xf32>
    %37 = arith.mulf %26, %32 : vector<1x1xf32>
    %38 = arith.mulf %36, %37 : vector<1x1xf32>
    %39 = arith.addf %38, %34 : vector<1x1xf32>
    %c1_i32 = arith.constant 1 : i32
    %40 = arith.addi %30, %c1_i32 : i32
    %41 = arith.index_cast %40 : i32 to index
    %c0_16 = arith.constant 0 : index
    %42 = vector.load %arg5[%41, %c0_16] : memref<17x1xf32, #tpu.memory_space<vmem>>, vector<1x1xf32>
    tpu.vector_store %arg5[%41, %c0_16], %39 {strides = array<i32>} : memref<17x1xf32, #tpu.memory_space<vmem>>, vector<1x1xf32>,
    %c1_i32_17 = arith.constant 1 : i32
    %43 = arith.addi %29, %c1_i32_17 : i32
    %44 = arith.index_cast %43 : i32 to index
    %c0_18 = arith.constant 0 : index
    %45 = vector.load %arg6[%44, %c0_18] : memref<16x1xf32, #tpu.memory_space<vmem>>, vector<1x1xf32>
    %46 = arith.index_cast %43 : i32 to index
    %c0_19 = arith.constant 0 : index
    %47 = vector.load %arg7[%46, %c0_19] : memref<16x1xf32, #tpu.memory_space<vmem>>, vector<1x1xf32>
    %48 = arith.mulf %24, %39 : vector<1x1xf32>
    %49 = math.exp %48 : vector<1x1xf32>
    %50 = arith.mulf %39, %45 : vector<1x1xf32>
    %51 = arith.mulf %49, %50 : vector<1x1xf32>
    %52 = arith.addf %51, %47 : vector<1x1xf32>
    %c1_i32_20 = arith.constant 1 : i32
    %53 = arith.addi %43, %c1_i32_20 : i32
    %54 = arith.index_cast %53 : i32 to index
    %c0_21 = arith.constant 0 : index
    %55 = vector.load %arg5[%54, %c0_21] : memref<17x1xf32, #tpu.memory_space<vmem>>, vector<1x1xf32>
    tpu.vector_store %arg5[%54, %c0_21], %52 {strides = array<i32>} : memref<17x1xf32, #tpu.memory_space<vmem>>, vector<1x1xf32>,
    %c2_i32 = arith.constant 2 : i32
    %56 = arith.addi %29, %c2_i32 : i32
    %57 = arith.index_cast %56 : i32 to index
    %c0_22 = arith.constant 0 : index
    %58 = vector.load %arg6[%57, %c0_22] : memref<16x1xf32, #tpu.memory_space<vmem>>, vector<1x1xf32>
    %59 = arith.index_cast %56 : i32 to index
    %c0_23 = arith.constant 0 : index
    %60 = vector.load %arg7[%59, %c0_23] : memref<16x1xf32, #tpu.memory_space<vmem>>, vector<1x1xf32>
    %61 = arith.mulf %24, %52 : vector<1x1xf32>
    %62 = math.exp %61 : vector<1x1xf32>
    %63 = arith.mulf %52, %58 : vector<1x1xf32>
    %64 = arith.mulf %62, %63 : vector<1x1xf32>
    %65 = arith.addf %64, %60 : vector<1x1xf32>
    %c1_i32_24 = arith.constant 1 : i32
    %66 = arith.addi %56, %c1_i32_24 : i32
    %67 = arith.index_cast %66 : i32 to index
    %c0_25 = arith.constant 0 : index
    %68 = vector.load %arg5[%67, %c0_25] : memref<17x1xf32, #tpu.memory_space<vmem>>, vector<1x1xf32>
    tpu.vector_store %arg5[%67, %c0_25], %65 {strides = array<i32>} : memref<17x1xf32, #tpu.memory_space<vmem>>, vector<1x1xf32>,
    %c3_i32 = arith.constant 3 : i32
    %69 = arith.addi %29, %c3_i32 : i32
    %70 = arith.index_cast %69 : i32 to index
    %c0_26 = arith.constant 0 : index
    %71 = vector.load %arg6[%70, %c0_26] : memref<16x1xf32, #tpu.memory_space<vmem>>, vector<1x1xf32>
    %72 = arith.index_cast %69 : i32 to index
    %c0_27 = arith.constant 0 : index
    %73 = vector.load %arg7[%72, %c0_27] : memref<16x1xf32, #tpu.memory_space<vmem>>, vector<1x1xf32>
    %74 = arith.mulf %24, %65 : vector<1x1xf32>
    %75 = math.exp %74 : vector<1x1xf32>
    %76 = arith.mulf %65, %71 : vector<1x1xf32>
    %77 = arith.mulf %75, %76 : vector<1x1xf32>
    %78 = arith.addf %77, %73 : vector<1x1xf32>
    %c1_i32_28 = arith.constant 1 : i32
    %79 = arith.addi %69, %c1_i32_28 : i32
    %80 = arith.index_cast %79 : i32 to index
    %c0_29 = arith.constant 0 : index
    %81 = vector.load %arg5[%80, %c0_29] : memref<17x1xf32, #tpu.memory_space<vmem>>, vector<1x1xf32>
    tpu.vector_store %arg5[%80, %c0_29], %78 {strides = array<i32>} : memref<17x1xf32, #tpu.memory_space<vmem>>, vector<1x1xf32>,
    %c4_i32 = arith.constant 4 : i32
    %82 = arith.addi %29, %c4_i32 : i32
    %83 = arith.index_cast %82 : i32 to index
    %c0_30 = arith.constant 0 : index
    %84 = vector.load %arg6[%83, %c0_30] : memref<16x1xf32, #tpu.memory_space<vmem>>, vector<1x1xf32>
    %85 = arith.index_cast %82 : i32 to index
    %c0_31 = arith.constant 0 : index
    %86 = vector.load %arg7[%85, %c0_31] : memref<16x1xf32, #tpu.memory_space<vmem>>, vector<1x1xf32>
    %87 = arith.mulf %24, %78 : vector<1x1xf32>
    %88 = math.exp %87 : vector<1x1xf32>
    %89 = arith.mulf %78, %84 : vector<1x1xf32>
    %90 = arith.mulf %88, %89 : vector<1x1xf32>
    %91 = arith.addf %90, %86 : vector<1x1xf32>
    %c1_i32_32 = arith.constant 1 : i32
    %92 = arith.addi %82, %c1_i32_32 : i32
    %93 = arith.index_cast %92 : i32 to index
    %c0_33 = arith.constant 0 : index
    %94 = vector.load %arg5[%93, %c0_33] : memref<17x1xf32, #tpu.memory_space<vmem>>, vector<1x1xf32>
    tpu.vector_store %arg5[%93, %c0_33], %91 {strides = array<i32>} : memref<17x1xf32, #tpu.memory_space<vmem>>, vector<1x1xf32>,
    %c5_i32 = arith.constant 5 : i32
    %95 = arith.addi %29, %c5_i32 : i32
    %96 = arith.index_cast %95 : i32 to index
    %c0_34 = arith.constant 0 : index
    %97 = vector.load %arg6[%96, %c0_34] : memref<16x1xf32, #tpu.memory_space<vmem>>, vector<1x1xf32>
    %98 = arith.index_cast %95 : i32 to index
    %c0_35 = arith.constant 0 : index
    %99 = vector.load %arg7[%98, %c0_35] : memref<16x1xf32, #tpu.memory_space<vmem>>, vector<1x1xf32>
    %100 = arith.mulf %24, %91 : vector<1x1xf32>
    %101 = math.exp %100 : vector<1x1xf32>
    %102 = arith.mulf %91, %97 : vector<1x1xf32>
    %103 = arith.mulf %101, %102 : vector<1x1xf32>
    %104 = arith.addf %103, %99 : vector<1x1xf32>
    %c1_i32_36 = arith.constant 1 : i32
    %105 = arith.addi %95, %c1_i32_36 : i32
    %106 = arith.index_cast %105 : i32 to index
    %c0_37 = arith.constant 0 : index
    %107 = vector.load %arg5[%106, %c0_37] : memref<17x1xf32, #tpu.memory_space<vmem>>, vector<1x1xf32>
    tpu.vector_store %arg5[%106, %c0_37], %104 {strides = array<i32>} : memref<17x1xf32, #tpu.memory_space<vmem>>, vector<1x1xf32>,
    %c6_i32 = arith.constant 6 : i32
    %108 = arith.addi %29, %c6_i32 : i32
    %109 = arith.index_cast %108 : i32 to index
    %c0_38 = arith.constant 0 : index
    %110 = vector.load %arg6[%109, %c0_38] : memref<16x1xf32, #tpu.memory_space<vmem>>, vector<1x1xf32>
    %111 = arith.index_cast %108 : i32 to index
    %c0_39 = arith.constant 0 : index
    %112 = vector.load %arg7[%111, %c0_39] : memref<16x1xf32, #tpu.memory_space<vmem>>, vector<1x1xf32>
    %113 = arith.mulf %24, %104 : vector<1x1xf32>
    %114 = math.exp %113 : vector<1x1xf32>
    %115 = arith.mulf %104, %110 : vector<1x1xf32>
    %116 = arith.mulf %114, %115 : vector<1x1xf32>
    %117 = arith.addf %116, %112 : vector<1x1xf32>
    %c1_i32_40 = arith.constant 1 : i32
    %118 = arith.addi %108, %c1_i32_40 : i32
    %119 = arith.index_cast %118 : i32 to index
    %c0_41 = arith.constant 0 : index
    %120 = vector.load %arg5[%119, %c0_41] : memref<17x1xf32, #tpu.memory_space<vmem>>, vector<1x1xf32>
    tpu.vector_store %arg5[%119, %c0_41], %117 {strides = array<i32>} : memref<17x1xf32, #tpu.memory_space<vmem>>, vector<1x1xf32>,
    %c7_i32 = arith.constant 7 : i32
    %121 = arith.addi %29, %c7_i32 : i32
    %122 = arith.index_cast %121 : i32 to index
    %c0_42 = arith.constant 0 : index
    %123 = vector.load %arg6[%122, %c0_42] : memref<16x1xf32, #tpu.memory_space<vmem>>, vector<1x1xf32>
    %124 = arith.index_cast %121 : i32 to index
    %c0_43 = arith.constant 0 : index
    %125 = vector.load %arg7[%124, %c0_43] : memref<16x1xf32, #tpu.memory_space<vmem>>, vector<1x1xf32>
    %126 = arith.mulf %24, %117 : vector<1x1xf32>
    %127 = math.exp %126 : vector<1x1xf32>
    %128 = arith.mulf %117, %123 : vector<1x1xf32>
    %129 = arith.mulf %127, %128 : vector<1x1xf32>
    %130 = arith.addf %129, %125 : vector<1x1xf32>
    %c1_i32_44 = arith.constant 1 : i32
    %131 = arith.addi %121, %c1_i32_44 : i32
    %132 = arith.index_cast %131 : i32 to index
    %c0_45 = arith.constant 0 : index
    %133 = vector.load %arg5[%132, %c0_45] : memref<17x1xf32, #tpu.memory_space<vmem>>, vector<1x1xf32>
    tpu.vector_store %arg5[%132, %c0_45], %130 {strides = array<i32>} : memref<17x1xf32, #tpu.memory_space<vmem>>, vector<1x1xf32>,
    %c8_i32 = arith.constant 8 : i32
    %134 = arith.addi %29, %c8_i32 : i32
    %135 = arith.index_cast %134 : i32 to index
    %c0_46 = arith.constant 0 : index
    %136 = vector.load %arg6[%135, %c0_46] : memref<16x1xf32, #tpu.memory_space<vmem>>, vector<1x1xf32>
    %137 = arith.index_cast %134 : i32 to index
    %c0_47 = arith.constant 0 : index
    %138 = vector.load %arg7[%137, %c0_47] : memref<16x1xf32, #tpu.memory_space<vmem>>, vector<1x1xf32>
    %139 = arith.mulf %24, %130 : vector<1x1xf32>
    %140 = math.exp %139 : vector<1x1xf32>
    %141 = arith.mulf %130, %136 : vector<1x1xf32>
    %142 = arith.mulf %140, %141 : vector<1x1xf32>
    %143 = arith.addf %142, %138 : vector<1x1xf32>
    %c1_i32_48 = arith.constant 1 : i32
    %144 = arith.addi %134, %c1_i32_48 : i32
    %145 = arith.index_cast %144 : i32 to index
    %c0_49 = arith.constant 0 : index
    %146 = vector.load %arg5[%145, %c0_49] : memref<17x1xf32, #tpu.memory_space<vmem>>, vector<1x1xf32>
    tpu.vector_store %arg5[%145, %c0_49], %143 {strides = array<i32>} : memref<17x1xf32, #tpu.memory_space<vmem>>, vector<1x1xf32>,
    %c9_i32 = arith.constant 9 : i32
    %147 = arith.addi %29, %c9_i32 : i32
    %148 = arith.index_cast %147 : i32 to index
    %c0_50 = arith.constant 0 : index
    %149 = vector.load %arg6[%148, %c0_50] : memref<16x1xf32, #tpu.memory_space<vmem>>, vector<1x1xf32>
    %150 = arith.index_cast %147 : i32 to index
    %c0_51 = arith.constant 0 : index
    %151 = vector.load %arg7[%150, %c0_51] : memref<16x1xf32, #tpu.memory_space<vmem>>, vector<1x1xf32>
    %152 = arith.mulf %24, %143 : vector<1x1xf32>
    %153 = math.exp %152 : vector<1x1xf32>
    %154 = arith.mulf %143, %149 : vector<1x1xf32>
    %155 = arith.mulf %153, %154 : vector<1x1xf32>
    %156 = arith.addf %155, %151 : vector<1x1xf32>
    %c1_i32_52 = arith.constant 1 : i32
    %157 = arith.addi %147, %c1_i32_52 : i32
    %158 = arith.index_cast %157 : i32 to index
    %c0_53 = arith.constant 0 : index
    %159 = vector.load %arg5[%158, %c0_53] : memref<17x1xf32, #tpu.memory_space<vmem>>, vector<1x1xf32>
    tpu.vector_store %arg5[%158, %c0_53], %156 {strides = array<i32>} : memref<17x1xf32, #tpu.memory_space<vmem>>, vector<1x1xf32>,
    %c10_i32 = arith.constant 10 : i32
    %160 = arith.addi %29, %c10_i32 : i32
    %161 = arith.index_cast %160 : i32 to index
    %c0_54 = arith.constant 0 : index
    %162 = vector.load %arg6[%161, %c0_54] : memref<16x1xf32, #tpu.memory_space<vmem>>, vector<1x1xf32>
    %163 = arith.index_cast %160 : i32 to index
    %c0_55 = arith.constant 0 : index
    %164 = vector.load %arg7[%163, %c0_55] : memref<16x1xf32, #tpu.memory_space<vmem>>, vector<1x1xf32>
    %165 = arith.mulf %24, %156 : vector<1x1xf32>
    %166 = math.exp %165 : vector<1x1xf32>
    %167 = arith.mulf %156, %162 : vector<1x1xf32>
    %168 = arith.mulf %166, %167 : vector<1x1xf32>
    %169 = arith.addf %168, %164 : vector<1x1xf32>
    %c1_i32_56 = arith.constant 1 : i32
    %170 = arith.addi %160, %c1_i32_56 : i32
    %171 = arith.index_cast %170 : i32 to index
    %c0_57 = arith.constant 0 : index
    %172 = vector.load %arg5[%171, %c0_57] : memref<17x1xf32, #tpu.memory_space<vmem>>, vector<1x1xf32>
    tpu.vector_store %arg5[%171, %c0_57], %169 {strides = array<i32>} : memref<17x1xf32, #tpu.memory_space<vmem>>, vector<1x1xf32>,
    %c11_i32 = arith.constant 11 : i32
    %173 = arith.addi %29, %c11_i32 : i32
    %174 = arith.index_cast %173 : i32 to index
    %c0_58 = arith.constant 0 : index
    %175 = vector.load %arg6[%174, %c0_58] : memref<16x1xf32, #tpu.memory_space<vmem>>, vector<1x1xf32>
    %176 = arith.index_cast %173 : i32 to index
    %c0_59 = arith.constant 0 : index
    %177 = vector.load %arg7[%176, %c0_59] : memref<16x1xf32, #tpu.memory_space<vmem>>, vector<1x1xf32>
    %178 = arith.mulf %24, %169 : vector<1x1xf32>
    %179 = math.exp %178 : vector<1x1xf32>
    %180 = arith.mulf %169, %175 : vector<1x1xf32>
    %181 = arith.mulf %179, %180 : vector<1x1xf32>
    %182 = arith.addf %181, %177 : vector<1x1xf32>
    %c1_i32_60 = arith.constant 1 : i32
    %183 = arith.addi %173, %c1_i32_60 : i32
    %184 = arith.index_cast %183 : i32 to index
    %c0_61 = arith.constant 0 : index
    %185 = vector.load %arg5[%184, %c0_61] : memref<17x1xf32, #tpu.memory_space<vmem>>, vector<1x1xf32>
    tpu.vector_store %arg5[%184, %c0_61], %182 {strides = array<i32>} : memref<17x1xf32, #tpu.memory_space<vmem>>, vector<1x1xf32>,
    %c12_i32 = arith.constant 12 : i32
    %186 = arith.addi %29, %c12_i32 : i32
    %187 = arith.index_cast %186 : i32 to index
    %c0_62 = arith.constant 0 : index
    %188 = vector.load %arg6[%187, %c0_62] : memref<16x1xf32, #tpu.memory_space<vmem>>, vector<1x1xf32>
    %189 = arith.index_cast %186 : i32 to index
    %c0_63 = arith.constant 0 : index
    %190 = vector.load %arg7[%189, %c0_63] : memref<16x1xf32, #tpu.memory_space<vmem>>, vector<1x1xf32>
    %191 = arith.mulf %24, %182 : vector<1x1xf32>
    %192 = math.exp %191 : vector<1x1xf32>
    %193 = arith.mulf %182, %188 : vector<1x1xf32>
    %194 = arith.mulf %192, %193 : vector<1x1xf32>
    %195 = arith.addf %194, %190 : vector<1x1xf32>
    %c1_i32_64 = arith.constant 1 : i32
    %196 = arith.addi %186, %c1_i32_64 : i32
    %197 = arith.index_cast %196 : i32 to index
    %c0_65 = arith.constant 0 : index
    %198 = vector.load %arg5[%197, %c0_65] : memref<17x1xf32, #tpu.memory_space<vmem>>, vector<1x1xf32>
    tpu.vector_store %arg5[%197, %c0_65], %195 {strides = array<i32>} : memref<17x1xf32, #tpu.memory_space<vmem>>, vector<1x1xf32>,
    %c13_i32 = arith.constant 13 : i32
    %199 = arith.addi %29, %c13_i32 : i32
    %200 = arith.index_cast %199 : i32 to index
    %c0_66 = arith.constant 0 : index
    %201 = vector.load %arg6[%200, %c0_66] : memref<16x1xf32, #tpu.memory_space<vmem>>, vector<1x1xf32>
    %202 = arith.index_cast %199 : i32 to index
    %c0_67 = arith.constant 0 : index
    %203 = vector.load %arg7[%202, %c0_67] : memref<16x1xf32, #tpu.memory_space<vmem>>, vector<1x1xf32>
    %204 = arith.mulf %24, %195 : vector<1x1xf32>
    %205 = math.exp %204 : vector<1x1xf32>
    %206 = arith.mulf %195, %201 : vector<1x1xf32>
    %207 = arith.mulf %205, %206 : vector<1x1xf32>
    %208 = arith.addf %207, %203 : vector<1x1xf32>
    %c1_i32_68 = arith.constant 1 : i32
    %209 = arith.addi %199, %c1_i32_68 : i32
    %210 = arith.index_cast %209 : i32 to index
    %c0_69 = arith.constant 0 : index
    %211 = vector.load %arg5[%210, %c0_69] : memref<17x1xf32, #tpu.memory_space<vmem>>, vector<1x1xf32>
    tpu.vector_store %arg5[%210, %c0_69], %208 {strides = array<i32>} : memref<17x1xf32, #tpu.memory_space<vmem>>, vector<1x1xf32>,
    %c14_i32 = arith.constant 14 : i32
    %212 = arith.addi %29, %c14_i32 : i32
    %213 = arith.index_cast %212 : i32 to index
    %c0_70 = arith.constant 0 : index
    %214 = vector.load %arg6[%213, %c0_70] : memref<16x1xf32, #tpu.memory_space<vmem>>, vector<1x1xf32>
    %215 = arith.index_cast %212 : i32 to index
    %c0_71 = arith.constant 0 : index
    %216 = vector.load %arg7[%215, %c0_71] : memref<16x1xf32, #tpu.memory_space<vmem>>, vector<1x1xf32>
    %217 = arith.mulf %24, %208 : vector<1x1xf32>
    %218 = math.exp %217 : vector<1x1xf32>
    %219 = arith.mulf %208, %214 : vector<1x1xf32>
    %220 = arith.mulf %218, %219 : vector<1x1xf32>
    %221 = arith.addf %220, %216 : vector<1x1xf32>
    %c1_i32_72 = arith.constant 1 : i32
    %222 = arith.addi %212, %c1_i32_72 : i32
    %223 = arith.index_cast %222 : i32 to index
    %c0_73 = arith.constant 0 : index
    %224 = vector.load %arg5[%223, %c0_73] : memref<17x1xf32, #tpu.memory_space<vmem>>, vector<1x1xf32>
    tpu.vector_store %arg5[%223, %c0_73], %221 {strides = array<i32>} : memref<17x1xf32, #tpu.memory_space<vmem>>, vector<1x1xf32>,
    %c15_i32 = arith.constant 15 : i32
    %225 = arith.addi %29, %c15_i32 : i32
    %226 = arith.index_cast %225 : i32 to index
    %c0_74 = arith.constant 0 : index
    %227 = vector.load %arg6[%226, %c0_74] : memref<16x1xf32, #tpu.memory_space<vmem>>, vector<1x1xf32>
    %228 = arith.index_cast %225 : i32 to index
    %c0_75 = arith.constant 0 : index
    %229 = vector.load %arg7[%228, %c0_75] : memref<16x1xf32, #tpu.memory_space<vmem>>, vector<1x1xf32>
    %230 = arith.mulf %24, %221 : vector<1x1xf32>
    %231 = math.exp %230 : vector<1x1xf32>
    %232 = arith.mulf %221, %227 : vector<1x1xf32>
    %233 = arith.mulf %231, %232 : vector<1x1xf32>
    %234 = arith.addf %233, %229 : vector<1x1xf32>
    %c1_i32_76 = arith.constant 1 : i32
    %235 = arith.addi %225, %c1_i32_76 : i32
    %236 = arith.index_cast %235 : i32 to index
    %c0_77 = arith.constant 0 : index
    %237 = vector.load %arg5[%236, %c0_77] : memref<17x1xf32, #tpu.memory_space<vmem>>, vector<1x1xf32>
    tpu.vector_store %arg5[%236, %c0_77], %234 {strides = array<i32>} : memref<17x1xf32, #tpu.memory_space<vmem>>, vector<1x1xf32>,
    %c1_i32_78 = arith.constant 1 : i32
    return
  }
}

</mosaic_0001>

<bundles_post_ra>
// kernel: tpu_custom_call.1
= control target key start
LH: loop header
LB: loop body
LE: loop exit
PB: predicated region body
PF: predicated region fallthrough
CT: control target
= control target key end

     0   :  { %12 = vsyncpa [#allocation7], 0  ;;  %s562_s0 = inlined_call_operand.vmem [shape: f32[4], index: 0, kind: input, shape index: {}]   ;;  %s563_s1 = inlined_call_operand.<no memory space> [shape: f32[1], index: 1, kind: input, shape index: {}]   ;;  %s564_s2 = inlined_call_operand.<no memory space> [shape: f32[1], index: 2, kind: input, shape index: {}]   ;;  %s565_s3 = inlined_call_operand.vmem [shape: f32[16,1], index: 3, kind: input, shape index: {}]   ;;  %s566_s4 = inlined_call_operand.vmem [shape: f32[16,1], index: 4, kind: input, shape index: {}]   ;;  %s567_s5 = inlined_call_operand.vmem [shape: f32[17,1], index: 5, kind: output, shape index: {}]  }
   0x1   :  { %s19_s20 = sshll.u32 %s562_s0, 4  ;;  %s20_s20 = int_to_ptr.vmem [resolvable:$true] %s19_s20 }
   0x2   :  { %s391_s21 = scalar_lea.vmem %s20_s20, 16  ;;  %p396_p1 = scmp.lt.s32.totalorder %s20_s20, %s20_s20 }
   0x3   :  { %p392_p0 = scmp.ne.s32.totalorder %s20_s20, %s391_s21  ;;  %p397_p2 = scmp.lt.s32.totalorder %s391_s21, %s391_s21 }
   0x5   :  { %p398_p3 = por %p397_p2, %p396_p1 }
   0x7   :  { %p399_p4 = pnand %p398_p3, %p392_p0 }
   0x9   :  { %402 = shalt.err (!%p399_p4)
}
   0xa   :  { %s405_s22 = smov [#allocation6]  }
   0xb   :  { %22 = dma.vmem_to_smem %s20_s20, 16, %s405_s22, [#allocation7]  }
   0xc   :  { %403 = dma.done.wait [#allocation7], 16  }
   0xd   :  { %404 = vsyncadd [#allocation7], 4294967280 }
   0xe   :  { %34 = sfence }
   0xf   :  { %v64_v0 = vld [vmem:[%s566_s4] sm:$0xff]  ;;  %v66_v1 = vstv %s564_s2  ;;  %v75_v2 = vstv %s563_s1  ;;  %vm76_vm0 = vcmask 0   ;;  %s448_s28 = sld [smem:[#allocation6]]  ;;  %vm61_vm1 = vcmask 7168   ;;  %v41_v23 = vld [vmem:[%s565_s3 + $0x8] sm:$0xff] }
  0x10   :  { %v67_v3 = vmul.f32 %v66_v1, %v64_v0  ;;  %77 = vst.msk [vmem:[%s567_s5] sm:$0x1] %vm76_vm0, %v75_v2  ;;  %s458_s8 = sld [smem:[#allocation6 + $0x2]]  ;;  %v40_v4 = vld [vmem:[%s565_s3] sm:$0xff]  ;;  %v65_v44 = vld [vmem:[%s566_s4 + $0x8] sm:$0xff] }
  0x11   :  { %s337_s1 = sld [smem:[#allocation6 + $0x3]]  ;;  %v68_v45 = vmul.f32 %v66_v1, %v65_v44 }
  0x12   :  { %69 = vst.msk [vmem:[#allocation3] sm:$0xff] %vm61_vm1, %v67_v3  ;;  %s335_s9 = sld [smem:[#allocation6 + $0x1]] }
  0x13   :  { %70 = vst.msk [vmem:[#allocation3 + $0x8] sm:$0xff] %vm61_vm1, %v68_v45 }
  0x15   :  { %s71_s12 = ssub.f32 0.0, %s448_s28  ;;  %v54_v11 = vstv %s448_s28 }
  0x16   :  { %v42_v5 = vstv %s458_s8 }
  0x17   :  { %v43_v6 = vmul.f32 %v42_v5, %v40_v4  ;;  %v47_v7 = vstv %s337_s1  ;;  %v44_v25 = vmul.f32 %v42_v5, %v41_v23 }
  0x18   :  { %v48_v8 = vmul.f32 %v47_v7, %v40_v4  ;;  %s72_s13 = smul.f32 %s335_s9, %s71_s12  ;;  %v49_v26 = vmul.f32 %v47_v7, %v41_v23 }
  0x19   :  { %v45_v9 = vadd.f32 1.0, %v43_v6  ;;  %v79_v22 = vld [vmem:[#allocation3] sm:$0x1]  ;;  %v46_v28 = vadd.f32 1.0, %v44_v25  ;;  %v92_v40 = vld [vmem:[#allocation3 + $0x1] sm:$0x1] }
  0x1a   :  { %v50_v10 = vmul.f32 %v48_v8, %v40_v4  ;;  %v467_v14 = vstv %s72_s13  ;;  %v51_v29 = vmul.f32 %v49_v26, %v41_v23  ;;  %v105_v50 = vld [vmem:[#allocation3 + $0x2] sm:$0x1]  ;;  %v118_v58 = vld [vmem:[#allocation3 + $0x3] sm:$0x1] }
  0x1b   :  { %v80_v16 = vmul.f32 %v75_v2, %v467_v14 }
  0x1c   :  { %v52_v12 = vadd.f32 %v50_v10, %v45_v9  ;;  %v53_v31 = vadd.f32 %v51_v29, %v46_v28  ;;  %v144_v10 = vld [vmem:[#allocation3 + $0x5] sm:$0x1] }
  0x1d   :  { %v81_v17 = vmul.f32 1.442695, %v80_v16 }
  0x1e   :  { %v55_v13 = vmul.f32 %v54_v11, %v52_v12  ;;  %v56_v33 = vmul.f32 %v54_v11, %v53_v31 }
  0x20   :  { %v57_v15 = vmul.f32 1.442695, %v55_v13  ;;  %v59_v34 = vmul.f32 1.442695, %v56_v33 }
  0x22   :  { %355 = vpow2.f32 %v57_v15 }
  0x23   :  { %357 = vpow2.f32 %v81_v17 }
  0x2f   :  { %v356_v18 = vpop.eup %355 }
  0x30   :  { %62 = vst.msk [vmem:[#allocation2] sm:$0xff] %vm61_vm1, %v356_v18  ;;  %v358_v19 = vpop.eup %357 }
  0x37   :  { %v78_v20 = vld [vmem:[#allocation2] sm:$0x1]  ;;  %v90_v35 = vld [vmem:[#allocation2 + $0x1] sm:$0x1]  ;;  %v103_v46 = vld [vmem:[#allocation2 + $0x2] sm:$0x1] }
  0x38   :  { %v83_v21 = vmul.f32 %v78_v20, %v75_v2  ;;  %v116_v54 = vld [vmem:[#allocation2 + $0x3] sm:$0x1]  ;;  %v129_v62 = vld [vmem:[#allocation2 + $0x4] sm:$0x1]  ;;  %v131_v2 = vld [vmem:[#allocation3 + $0x4] sm:$0x1] }
  0x39   :  { %v142_v6 = vld [vmem:[#allocation2 + $0x5] sm:$0x1]  ;;  %v155_v15 = vld [vmem:[#allocation2 + $0x6] sm:$0x1]  ;;  %v168_v23 = vld [vmem:[#allocation2 + $0x7] sm:$0x1] }
  0x3a   :  { %v84_v24 = vmul.f32 %v358_v19, %v83_v21  ;;  %v157_v19 = vld [vmem:[#allocation3 + $0x6] sm:$0x1] }
  0x3c   :  { %v85_v27 = vadd.f32 %v84_v24, %v79_v22 }
  0x3e   :  { %338 = vst.msk [vmem:[%s567_s5 + $0x1] sm:$0x1] %vm76_vm0, %v85_v27  ;;  %v93_v30 = vmul.f32 %v85_v27, %v467_v14  ;;  %v96_v36 = vmul.f32 %v90_v35, %v85_v27  ;;  %v170_v27 = vld [vmem:[#allocation3 + $0x7] sm:$0x1] }
  0x40   :  { %v94_v32 = vmul.f32 1.442695, %v93_v30 }
  0x42   :  { %359 = vpow2.f32 %v94_v32 }
  0x43   :  { %361 = vpow2.f32 %v59_v34  ;;  %v183_v34 = vld [vmem:[#allocation3 + $0x8] sm:$0x1] }
  0x4f   :  { %v360_v37 = vpop.eup %359 }
  0x50   :  { %v97_v38 = vmul.f32 %v360_v37, %v96_v36  ;;  %v362_v39 = vpop.eup %361 }
  0x51   :  { %63 = vst.msk [vmem:[#allocation2 + $0x8] sm:$0xff] %vm61_vm1, %v362_v39 }
  0x52   :  { %v98_v41 = vadd.f32 %v97_v38, %v92_v40 }
  0x54   :  { %339 = vst.msk [vmem:[%s567_s5 + $0x2] sm:$0x1] %vm76_vm0, %v98_v41  ;;  %v106_v42 = vmul.f32 %v98_v41, %v467_v14  ;;  %v109_v47 = vmul.f32 %v103_v46, %v98_v41 }
  0x56   :  { %v107_v43 = vmul.f32 1.442695, %v106_v42 }
  0x58   :  { %363 = vpow2.f32 %v107_v43  ;;  %v181_v31 = vld [vmem:[#allocation2 + $0x8] sm:$0x1]  ;;  %v194_v39 = vld [vmem:[#allocation2 + $0x9] sm:$0x1]  ;;  %v196_v43 = vld [vmem:[#allocation3 + $0x9] sm:$0x1] }
  0x65   :  { %v364_v48 = vpop.eup %363 }
  0x66   :  { %v110_v49 = vmul.f32 %v364_v48, %v109_v47  ;;  %v207_v47 = vld [vmem:[#allocation2 + $0xa] sm:$0x1] }
  0x68   :  { %v111_v51 = vadd.f32 %v110_v49, %v105_v50 }
  0x6a   :  { %340 = vst.msk [vmem:[%s567_s5 + $0x3] sm:$0x1] %vm76_vm0, %v111_v51  ;;  %v119_v52 = vmul.f32 %v111_v51, %v467_v14  ;;  %v122_v55 = vmul.f32 %v116_v54, %v111_v51  ;;  %v209_v51 = vld [vmem:[#allocation3 + $0xa] sm:$0x1] }
  0x6c   :  { %v120_v53 = vmul.f32 1.442695, %v119_v52 }
  0x6e   :  { %365 = vpow2.f32 %v120_v53 }
  0x7b   :  { %v366_v56 = vpop.eup %365 }
  0x7c   :  { %v123_v57 = vmul.f32 %v366_v56, %v122_v55  ;;  %v220_v55 = vld [vmem:[#allocation2 + $0xb] sm:$0x1] }
  0x7e   :  { %v124_v59 = vadd.f32 %v123_v57, %v118_v58 }
  0x80   :  { %341 = vst.msk [vmem:[%s567_s5 + $0x4] sm:$0x1] %vm76_vm0, %v124_v59  ;;  %v132_v60 = vmul.f32 %v124_v59, %v467_v14  ;;  %v135_v63 = vmul.f32 %v129_v62, %v124_v59  ;;  %v222_v59 = vld [vmem:[#allocation3 + $0xb] sm:$0x1] }
  0x82   :  { %v133_v61 = vmul.f32 1.442695, %v132_v60 }
  0x84   :  { %367 = vpow2.f32 %v133_v61 }
  0x91   :  { %v368_v0 = vpop.eup %367 }
  0x92   :  { %v136_v1 = vmul.f32 %v368_v0, %v135_v63  ;;  %v233_v63 = vld [vmem:[#allocation2 + $0xc] sm:$0x1] }
  0x94   :  { %v137_v3 = vadd.f32 %v136_v1, %v131_v2 }
  0x96   :  { %342 = vst.msk [vmem:[%s567_s5 + $0x5] sm:$0x1] %vm76_vm0, %v137_v3  ;;  %v145_v4 = vmul.f32 %v137_v3, %v467_v14  ;;  %v148_v7 = vmul.f32 %v142_v6, %v137_v3  ;;  %v235_v3 = vld [vmem:[#allocation3 + $0xc] sm:$0x1] }
  0x98   :  { %v146_v5 = vmul.f32 1.442695, %v145_v4 }
  0x9a   :  { %369 = vpow2.f32 %v146_v5 }
  0xa7   :  { %v370_v8 = vpop.eup %369 }
  0xa8   :  { %v149_v9 = vmul.f32 %v370_v8, %v148_v7  ;;  %v246_v7 = vld [vmem:[#allocation2 + $0xd] sm:$0x1] }
  0xaa   :  { %v150_v11 = vadd.f32 %v149_v9, %v144_v10 }
  0xac   :  { %343 = vst.msk [vmem:[%s567_s5 + $0x6] sm:$0x1] %vm76_vm0, %v150_v11  ;;  %v158_v12 = vmul.f32 %v150_v11, %v467_v14  ;;  %v161_v16 = vmul.f32 %v155_v15, %v150_v11  ;;  %v248_v11 = vld [vmem:[#allocation3 + $0xd] sm:$0x1] }
  0xae   :  { %v159_v13 = vmul.f32 1.442695, %v158_v12 }
  0xb0   :  { %371 = vpow2.f32 %v159_v13 }
  0xbd   :  { %v372_v17 = vpop.eup %371 }
  0xbe   :  { %v162_v18 = vmul.f32 %v372_v17, %v161_v16  ;;  %v259_v16 = vld [vmem:[#allocation2 + $0xe] sm:$0x1] }
  0xc0   :  { %v163_v20 = vadd.f32 %v162_v18, %v157_v19 }
  0xc2   :  { %344 = vst.msk [vmem:[%s567_s5 + $0x7] sm:$0x1] %vm76_vm0, %v163_v20  ;;  %v171_v21 = vmul.f32 %v163_v20, %v467_v14  ;;  %v174_v24 = vmul.f32 %v168_v23, %v163_v20  ;;  %v261_v20 = vld [vmem:[#allocation3 + $0xe] sm:$0x1] }
  0xc4   :  { %v172_v22 = vmul.f32 1.442695, %v171_v21 }
  0xc6   :  { %373 = vpow2.f32 %v172_v22 }
  0xd3   :  { %v374_v25 = vpop.eup %373 }
  0xd4   :  { %v175_v26 = vmul.f32 %v374_v25, %v174_v24  ;;  %v272_v24 = vld [vmem:[#allocation2 + $0xf] sm:$0x1] }
  0xd6   :  { %v176_v28 = vadd.f32 %v175_v26, %v170_v27 }
  0xd8   :  { %345 = vst.msk [vmem:[%s567_s5 + $0x8] sm:$0x1] %vm76_vm0, %v176_v28  ;;  %v184_v29 = vmul.f32 %v176_v28, %v467_v14  ;;  %v187_v32 = vmul.f32 %v181_v31, %v176_v28  ;;  %v274_v28 = vld [vmem:[#allocation3 + $0xf] sm:$0x1] }
  0xda   :  { %v185_v30 = vmul.f32 1.442695, %v184_v29 }
  0xdc   :  { %375 = vpow2.f32 %v185_v30 }
  0xe9   :  { %v376_v33 = vpop.eup %375 }
  0xea   :  { %v188_v35 = vmul.f32 %v376_v33, %v187_v32 }
  0xec   :  { %v189_v36 = vadd.f32 %v188_v35, %v183_v34 }
  0xee   :  { %346 = vst.msk [vmem:[%s567_s5 + $0x9] sm:$0x1] %vm76_vm0, %v189_v36  ;;  %v197_v37 = vmul.f32 %v189_v36, %v467_v14  ;;  %v200_v40 = vmul.f32 %v194_v39, %v189_v36 }
  0xf0   :  { %v198_v38 = vmul.f32 1.442695, %v197_v37 }
  0xf2   :  { %377 = vpow2.f32 %v198_v38 }
  0xff   :  { %v378_v41 = vpop.eup %377 }
 0x100   :  { %v201_v42 = vmul.f32 %v378_v41, %v200_v40 }
 0x102   :  { %v202_v44 = vadd.f32 %v201_v42, %v196_v43 }
 0x104   :  { %347 = vst.msk [vmem:[%s567_s5 + $0xa] sm:$0x1] %vm76_vm0, %v202_v44  ;;  %v210_v45 = vmul.f32 %v202_v44, %v467_v14  ;;  %v213_v48 = vmul.f32 %v207_v47, %v202_v44 }
 0x106   :  { %v211_v46 = vmul.f32 1.442695, %v210_v45 }
 0x108   :  { %379 = vpow2.f32 %v211_v46 }
 0x115   :  { %v380_v49 = vpop.eup %379 }
 0x116   :  { %v214_v50 = vmul.f32 %v380_v49, %v213_v48 }
 0x118   :  { %v215_v52 = vadd.f32 %v214_v50, %v209_v51 }
 0x11a   :  { %348 = vst.msk [vmem:[%s567_s5 + $0xb] sm:$0x1] %vm76_vm0, %v215_v52  ;;  %v223_v53 = vmul.f32 %v215_v52, %v467_v14  ;;  %v226_v56 = vmul.f32 %v220_v55, %v215_v52 }
 0x11c   :  { %v224_v54 = vmul.f32 1.442695, %v223_v53 }
 0x11e   :  { %381 = vpow2.f32 %v224_v54 }
 0x12b   :  { %v382_v57 = vpop.eup %381 }
 0x12c   :  { %v227_v58 = vmul.f32 %v382_v57, %v226_v56 }
 0x12e   :  { %v228_v60 = vadd.f32 %v227_v58, %v222_v59 }
 0x130   :  { %349 = vst.msk [vmem:[%s567_s5 + $0xc] sm:$0x1] %vm76_vm0, %v228_v60  ;;  %v236_v61 = vmul.f32 %v228_v60, %v467_v14  ;;  %v239_v0 = vmul.f32 %v233_v63, %v228_v60 }
 0x132   :  { %v237_v62 = vmul.f32 1.442695, %v236_v61 }
 0x134   :  { %383 = vpow2.f32 %v237_v62 }
 0x141   :  { %v384_v1 = vpop.eup %383 }
 0x142   :  { %v240_v2 = vmul.f32 %v384_v1, %v239_v0 }
 0x144   :  { %v241_v4 = vadd.f32 %v240_v2, %v235_v3 }
 0x146   :  { %350 = vst.msk [vmem:[%s567_s5 + $0xd] sm:$0x1] %vm76_vm0, %v241_v4  ;;  %v249_v5 = vmul.f32 %v241_v4, %v467_v14  ;;  %v252_v8 = vmul.f32 %v246_v7, %v241_v4 }
 0x148   :  { %v250_v6 = vmul.f32 1.442695, %v249_v5 }
 0x14a   :  { %385 = vpow2.f32 %v250_v6 }
 0x157   :  { %v386_v9 = vpop.eup %385 }
 0x158   :  { %v253_v10 = vmul.f32 %v386_v9, %v252_v8 }
 0x15a   :  { %v254_v12 = vadd.f32 %v253_v10, %v248_v11 }
 0x15c   :  { %351 = vst.msk [vmem:[%s567_s5 + $0xe] sm:$0x1] %vm76_vm0, %v254_v12  ;;  %v262_v13 = vmul.f32 %v254_v12, %v467_v14  ;;  %v265_v17 = vmul.f32 %v259_v16, %v254_v12 }
 0x15e   :  { %v263_v15 = vmul.f32 1.442695, %v262_v13 }
 0x160   :  { %387 = vpow2.f32 %v263_v15 }
 0x16d   :  { %v388_v18 = vpop.eup %387 }
 0x16e   :  { %v266_v19 = vmul.f32 %v388_v18, %v265_v17 }
 0x170   :  { %v267_v21 = vadd.f32 %v266_v19, %v261_v20 }
 0x172   :  { %352 = vst.msk [vmem:[%s567_s5 + $0xf] sm:$0x1] %vm76_vm0, %v267_v21  ;;  %v275_v22 = vmul.f32 %v267_v21, %v467_v14  ;;  %v278_v25 = vmul.f32 %v272_v24, %v267_v21 }
 0x174   :  { %v276_v23 = vmul.f32 1.442695, %v275_v22 }
 0x176   :  { %389 = vpow2.f32 %v276_v23 }
 0x183   :  { %v390_v26 = vpop.eup %389 }
 0x184   :  { %v279_v27 = vmul.f32 %v390_v26, %v278_v25 }
 0x186   :  { %v280_v29 = vadd.f32 %v279_v27, %v274_v28 }
 0x188   :  { %353 = vst.msk [vmem:[%s567_s5 + $0x10] sm:$0x1] %vm76_vm0, %v280_v29 }
 0x189   :  { %288 = vsyncpa [#allocation7], 1 }

</bundles_post_ra>
